<compile_context>
chip_gen: v6e
topology: v6e:2x2x1
jax: 0.10.0
libtpu: 0.0.40
codegen_flags: <defaults>
</compile_context>

<pallas_src>
import jax
import jax.numpy as jnp
from jax.experimental import pallas as pl
from jax.experimental.pallas import tpu as pltpu

BN_EPS = 1e-5

# ---- output layout ----
OUT_WIDTH = 34            # x_recon cols 0:30, mu cols 30:32, log_var cols 32:34

# ---- parameter-slab row layout (all static) ----
PARAM_SLAB_SHAPE = (64, OUT_WIDTH)
_W1_R = (0, 30)           # [30, 10] fc1 weight (stored [in, out]), cols 0:10
_W2_R = (32, 42)          # [10, 34] fused fc21 || fc22 weight at out-cols 30:34
_W3_R = (42, 44)          # [2, 10]  fc3 weight, cols 0:10
_W4_R = (44, 54)          # [10, 34] fc4 weight at out-cols 0:30
_B1_ROW = 54              # fc1.bias           cols 0:10
_G1_ROW = 55              # batchnorm1.weight  cols 0:10
_BE1_ROW = 56             # batchnorm1.bias    cols 0:10
_B2_ROW = 57              # fc21.bias||fc22.bias at out-cols 30:34
_B3_ROW = 58              # fc3.bias           cols 0:10
_G3_ROW = 59              # batchnorm3.weight  cols 0:10
_BE3_ROW = 60             # batchnorm3.bias    cols 0:10
_B4_ROW = 61              # fc4.bias at out-cols 0:30


def _batchnorm_train(h, gamma, beta):
    # BatchNorm1d, training mode: batch mean, biased batch variance, affine.
    mean = jnp.mean(h, axis=0, keepdims=True)
    var = jnp.mean((h - mean) ** 2, axis=0, keepdims=True)
    return (h - mean) * jax.lax.rsqrt(var + BN_EPS) * gamma + beta


def vae_novelty_kernel(x_ref, eps_ref, p_ref, out_ref):
    # ---- read inputs / parameters once (static slices of the VMEM slab) ----
    x = x_ref[...]                                  # [B, 30]
    eps = eps_ref[...]                              # [B, 2] uniform noise
    P = p_ref[...]                                  # [64, 34] parameter slab

    w1 = P[_W1_R[0]:_W1_R[1], 0:10]                 # [30, 10]
    w2o = P[_W2_R[0]:_W2_R[1], :]                   # [10, 34], nonzero only @30:34
    w3_r0 = P[_W3_R[0]:_W3_R[0] + 1, 0:10]          # [1, 10]
    w3_r1 = P[_W3_R[0] + 1:_W3_R[1], 0:10]          # [1, 10]
    w4o = P[_W4_R[0]:_W4_R[1], :]                   # [10, 34], nonzero only @0:30
    b1 = P[_B1_ROW:_B1_ROW + 1, 0:10]
    g1 = P[_G1_ROW:_G1_ROW + 1, 0:10]
    be1 = P[_BE1_ROW:_BE1_ROW + 1, 0:10]
    b2o = P[_B2_ROW:_B2_ROW + 1, :]                 # [1, 34], nonzero only @30:34
    b3 = P[_B3_ROW:_B3_ROW + 1, 0:10]
    g3 = P[_G3_ROW:_G3_ROW + 1, 0:10]
    be3 = P[_BE3_ROW:_BE3_ROW + 1, 0:10]
    b4o = P[_B4_ROW:_B4_ROW + 1, :]                 # [1, 34], nonzero only @0:30

    # ---- encode ----
    h1 = jnp.dot(x, w1, preferred_element_type=jnp.float32) + b1
    h1 = jnp.maximum(h1, 0.0)                       # ReLU
    h1 = _batchnorm_train(h1, g1, be1)              # [B, 10]

    # fused mu / log_var projection, already placed at output cols 30:34.
    ml34 = jnp.dot(h1, w2o, preferred_element_type=jnp.float32) + b2o  # [B, 34]
    mu = ml34[:, 30:32]
    log_var = ml34[:, 32:34]

    # ---- reparameterize (torch.rand_like -> uniform eps, supplied as input) --
    std = jnp.exp(log_var * 0.5)
    z = mu + eps * std                              # [B, 2]

    # ---- decode ----
    # K=2 contraction on the VPU: broadcast multiply-adds, no MXU round trip.
    h2 = z[:, 0:1] * w3_r0 + z[:, 1:2] * w3_r1 + b3  # [B, 10]
    h2 = jnp.maximum(h2, 0.0)
    h2 = _batchnorm_train(h2, g3, be3)

    # fc4, already placed at output cols 0:30.
    xr34 = jnp.dot(h2, w4o, preferred_element_type=jnp.float32) + b4o  # [B, 34]

    # ---- single full-width store: [x_recon | mu | log_var] ----
    # xr34 cols 30:34 are exactly 0 and ml34 cols 0:30 are exactly 0, so the
    # sum is the packed output row; one unmasked-width store, no zero fill.
    out_ref[...] = xr34 + ml34


def vae_novelty_forward(x, eps, param_slab):
    """x: [B, 30] f32, eps: [B, 2] uniform noise, param_slab: [64, 34] f32."""
    B = x.shape[0]
    vmem = pl.BlockSpec(memory_space=pltpu.MemorySpace.VMEM)
    out = pl.pallas_call(
        vae_novelty_kernel,
        out_shape=jax.ShapeDtypeStruct((B, OUT_WIDTH), jnp.float32),
        in_specs=[vmem, vmem, vmem],
        out_specs=vmem,
    )(x, eps, param_slab)

    x_recon = out[:, 0:30]
    mu = out[:, 30:32]
    log_var = out[:, 32:34]
    return x_recon, mu, log_var


def init_params(key):
    """Deterministic parameter init. Weights stored as [in, out] (transposed
    vs. PyTorch's [out, in]); biases/affine params kept 2-D as [1, out]."""
    ks = jax.random.split(key, 10)

    def linear(kw, kb, n_in, n_out):
        bound = 1.0 / jnp.sqrt(n_in)
        w = jax.random.uniform(kw, (n_in, n_out), jnp.float32, -bound, bound)
        b = jax.random.uniform(kb, (1, n_out), jnp.float32, -bound, bound)
        return w, b

    w1, b1 = linear(ks[0], ks[1], 30, 10)
    w21, b21 = linear(ks[2], ks[3], 10, 2)
    w22, b22 = linear(ks[4], ks[5], 10, 2)
    w3, b3 = linear(ks[6], ks[7], 2, 10)
    w4, b4 = linear(ks[8], ks[9], 10, 30)

    return dict(
        w1=w1, b1=b1,
        g1=jnp.ones((1, 10), jnp.float32), be1=jnp.zeros((1, 10), jnp.float32),
        w21=w21, b21=b21, w22=w22, b22=b22,
        w3=w3, b3=b3,
        g3=jnp.ones((1, 10), jnp.float32), be3=jnp.zeros((1, 10), jnp.float32),
        w4=w4, b4=b4,
    )


def pack_params(p):
    """Pack all parameters into one [64, 34] f32 slab (single DMA).
    fc21/fc22 are placed at output columns 30:34 and fc4 at output columns
    0:30 so the kernel can emit both into disjoint [B, 34] slabs and sum."""
    slab = jnp.zeros(PARAM_SLAB_SHAPE, jnp.float32)
    slab = slab.at[_W1_R[0]:_W1_R[1], 0:10].set(p["w1"])
    slab = slab.at[_W2_R[0]:_W2_R[1], 30:32].set(p["w21"])
    slab = slab.at[_W2_R[0]:_W2_R[1], 32:34].set(p["w22"])
    slab = slab.at[_W3_R[0]:_W3_R[1], 0:10].set(p["w3"])
    slab = slab.at[_W4_R[0]:_W4_R[1], 0:30].set(p["w4"])
    slab = slab.at[_B1_ROW, 0:10].set(p["b1"][0])
    slab = slab.at[_G1_ROW, 0:10].set(p["g1"][0])
    slab = slab.at[_BE1_ROW, 0:10].set(p["be1"][0])
    slab = slab.at[_B2_ROW, 30:32].set(p["b21"][0])
    slab = slab.at[_B2_ROW, 32:34].set(p["b22"][0])
    slab = slab.at[_B3_ROW, 0:10].set(p["b3"][0])
    slab = slab.at[_G3_ROW, 0:10].set(p["g3"][0])
    slab = slab.at[_BE3_ROW, 0:10].set(p["be3"][0])
    slab = slab.at[_B4_ROW, 0:30].set(p["b4"][0])
    return slab


def _reference_forward(x, eps, p):
    """Pure-JAX reference (same math, no Pallas) for a sanity check."""
    h1 = jnp.maximum(x @ p["w1"] + p["b1"], 0.0)
    h1 = _batchnorm_train(h1, p["g1"], p["be1"])
    mu = h1 @ p["w21"] + p["b21"]
    log_var = h1 @ p["w22"] + p["b22"]
    z = mu + eps * jnp.exp(log_var * 0.5)
    h2 = jnp.maximum(z @ p["w3"] + p["b3"], 0.0)
    h2 = _batchnorm_train(h2, p["g3"], p["be3"])
    return h2 @ p["w4"] + p["b4"], mu, log_var


if __name__ == "__main__":
    key = jax.random.PRNGKey(0)
    k_param, k_x, k_eps = jax.random.split(key, 3)

    B = 8
    params = init_params(k_param)
    slab = pack_params(params)
    x = jax.random.normal(k_x, (B, 30), jnp.float32)
    # torch.rand_like(std) -> uniform [0, 1)
    eps = jax.random.uniform(k_eps, (B, 2), jnp.float32)

    x_recon, mu, log_var = jax.block_until_ready(vae_novelty_forward(x, eps, slab))

    assert x_recon.shape == (B, 30)
    assert mu.shape == (B, 2)
    assert log_var.shape == (B, 2)

    xr_ref, mu_ref, lv_ref = _reference_forward(x, eps, params)
    assert jnp.allclose(x_recon, xr_ref, rtol=2e-3, atol=2e-3)
    assert jnp.allclose(mu, mu_ref, rtol=2e-3, atol=2e-3)
    assert jnp.allclose(log_var, lv_ref, rtol=2e-3, atol=2e-3)

    print("KERNEL_OK")
</pallas_src>

<mosaic_0001>
module attributes {stable_mosaic.version = 11 : i64} {
  func.func @vae_novelty_kernel(%arg0: memref<8x30xf32, #tpu.memory_space<vmem>>, %arg1: memref<8x2xf32, #tpu.memory_space<vmem>>, %arg2: memref<64x34xf32, #tpu.memory_space<vmem>>, %arg3: memref<8x34xf32, #tpu.memory_space<vmem>>) attributes {dimension_semantics = [], scalar_prefetch = 0 : i64, scratch_operands = 0 : i64, tpu.core_type = #tpu.core_type<tc>} {
    %c0 = arith.constant 0 : index
    %c0_0 = arith.constant 0 : index
    %0 = vector.load %arg0[%c0, %c0_0] : memref<8x30xf32, #tpu.memory_space<vmem>>, vector<8x30xf32>
    %c0_1 = arith.constant 0 : index
    %c0_2 = arith.constant 0 : index
    %1 = vector.load %arg1[%c0_1, %c0_2] : memref<8x2xf32, #tpu.memory_space<vmem>>, vector<8x2xf32>
    %c0_3 = arith.constant 0 : index
    %c0_4 = arith.constant 0 : index
    %2 = vector.load %arg2[%c0_3, %c0_4] : memref<64x34xf32, #tpu.memory_space<vmem>>, vector<64x34xf32>
    %3 = vector.extract_strided_slice %2 {offsets = [0, 0], sizes = [30, 10], strides = [1, 1]} : vector<64x34xf32> to vector<30x10xf32>
    %4 = vector.extract_strided_slice %2 {offsets = [32, 0], sizes = [10, 34], strides = [1, 1]} : vector<64x34xf32> to vector<10x34xf32>
    %5 = vector.extract_strided_slice %2 {offsets = [42, 0], sizes = [1, 10], strides = [1, 1]} : vector<64x34xf32> to vector<1x10xf32>
    %6 = vector.extract_strided_slice %2 {offsets = [43, 0], sizes = [1, 10], strides = [1, 1]} : vector<64x34xf32> to vector<1x10xf32>
    %7 = vector.extract_strided_slice %2 {offsets = [44, 0], sizes = [10, 34], strides = [1, 1]} : vector<64x34xf32> to vector<10x34xf32>
    %8 = vector.extract_strided_slice %2 {offsets = [54, 0], sizes = [1, 10], strides = [1, 1]} : vector<64x34xf32> to vector<1x10xf32>
    %9 = vector.extract_strided_slice %2 {offsets = [55, 0], sizes = [1, 10], strides = [1, 1]} : vector<64x34xf32> to vector<1x10xf32>
    %10 = vector.extract_strided_slice %2 {offsets = [56, 0], sizes = [1, 10], strides = [1, 1]} : vector<64x34xf32> to vector<1x10xf32>
    %11 = vector.extract_strided_slice %2 {offsets = [57, 0], sizes = [1, 34], strides = [1, 1]} : vector<64x34xf32> to vector<1x34xf32>
    %12 = vector.extract_strided_slice %2 {offsets = [58, 0], sizes = [1, 10], strides = [1, 1]} : vector<64x34xf32> to vector<1x10xf32>
    %13 = vector.extract_strided_slice %2 {offsets = [59, 0], sizes = [1, 10], strides = [1, 1]} : vector<64x34xf32> to vector<1x10xf32>
    %14 = vector.extract_strided_slice %2 {offsets = [60, 0], sizes = [1, 10], strides = [1, 1]} : vector<64x34xf32> to vector<1x10xf32>
    %15 = vector.extract_strided_slice %2 {offsets = [61, 0], sizes = [1, 34], strides = [1, 1]} : vector<64x34xf32> to vector<1x34xf32>
    %cst = arith.constant dense<0.000000e+00> : vector<8x10xf32>
    %16 = tpu.matmul %0, %3, %cst {dimension_numbers = #tpu.dot_dimension_numbers<[1], [0], [0], [1], [0, 0, 1, 1], [], []>} : vector<8x30xf32>, vector<30x10xf32>, vector<8x10xf32> -> vector<8x10xf32>
    %17 = vector.broadcast %8 : vector<1x10xf32> to vector<8x10xf32>
    %18 = arith.addf %16, %17 : vector<8x10xf32>
    %cst_5 = arith.constant 0.000000e+00 : f32
    %19 = vector.broadcast %cst_5 : f32 to vector<8x10xf32>
    %20 = arith.maximumf %18, %19 : vector<8x10xf32>
    %cst_6 = arith.constant dense<0.000000e+00> : vector<10xf32>
    %21 = vector.multi_reduction <add>, %20, %cst_6 [0] : vector<8x10xf32> to vector<10xf32>
    %22 = vector.shape_cast %21 : vector<10xf32> to vector<1x10xf32>
    %cst_7 = arith.constant 8.000000e+00 : f32
    %23 = vector.broadcast %cst_7 : f32 to vector<1x10xf32>
    %24 = arith.divf %22, %23 : vector<1x10xf32>
    %25 = vector.broadcast %24 : vector<1x10xf32> to vector<8x10xf32>
    %26 = arith.subf %20, %25 : vector<8x10xf32>
    %27 = arith.mulf %26, %26 : vector<8x10xf32>
    %cst_8 = arith.constant dense<0.000000e+00> : vector<10xf32>
    %28 = vector.multi_reduction <add>, %27, %cst_8 [0] : vector<8x10xf32> to vector<10xf32>
    %29 = vector.shape_cast %28 : vector<10xf32> to vector<1x10xf32>
    %cst_9 = arith.constant 8.000000e+00 : f32
    %30 = vector.broadcast %cst_9 : f32 to vector<1x10xf32>
    %31 = arith.divf %29, %30 : vector<1x10xf32>
    %32 = vector.broadcast %24 : vector<1x10xf32> to vector<8x10xf32>
    %33 = arith.subf %20, %32 : vector<8x10xf32>
    %cst_10 = arith.constant 9.99999974E-6 : f32
    %34 = vector.broadcast %cst_10 : f32 to vector<1x10xf32>
    %35 = arith.addf %31, %34 : vector<1x10xf32>
    %36 = math.rsqrt %35 : vector<1x10xf32>
    %37 = vector.broadcast %36 : vector<1x10xf32> to vector<8x10xf32>
    %38 = arith.mulf %33, %37 : vector<8x10xf32>
    %39 = vector.broadcast %9 : vector<1x10xf32> to vector<8x10xf32>
    %40 = arith.mulf %38, %39 : vector<8x10xf32>
    %41 = vector.broadcast %10 : vector<1x10xf32> to vector<8x10xf32>
    %42 = arith.addf %40, %41 : vector<8x10xf32>
    %cst_11 = arith.constant dense<0.000000e+00> : vector<8x34xf32>
    %43 = tpu.matmul %42, %4, %cst_11 {dimension_numbers = #tpu.dot_dimension_numbers<[1], [0], [0], [1], [0, 0, 1, 1], [], []>} : vector<8x10xf32>, vector<10x34xf32>, vector<8x34xf32> -> vector<8x34xf32>
    %44 = vector.broadcast %11 : vector<1x34xf32> to vector<8x34xf32>
    %45 = arith.addf %43, %44 : vector<8x34xf32>
    %46 = vector.extract_strided_slice %45 {offsets = [0, 30], sizes = [8, 2], strides = [1, 1]} : vector<8x34xf32> to vector<8x2xf32>
    %47 = vector.extract_strided_slice %45 {offsets = [0, 32], sizes = [8, 2], strides = [1, 1]} : vector<8x34xf32> to vector<8x2xf32>
    %cst_12 = arith.constant 5.000000e-01 : f32
    %48 = vector.broadcast %cst_12 : f32 to vector<8x2xf32>
    %49 = arith.mulf %47, %48 : vector<8x2xf32>
    %50 = math.exp %49 : vector<8x2xf32>
    %51 = arith.mulf %1, %50 : vector<8x2xf32>
    %52 = arith.addf %46, %51 : vector<8x2xf32>
    %53 = vector.extract_strided_slice %52 {offsets = [0, 0], sizes = [8, 1], strides = [1, 1]} : vector<8x2xf32> to vector<8x1xf32>
    %54 = vector.broadcast %53 : vector<8x1xf32> to vector<8x10xf32>
    %55 = vector.broadcast %5 : vector<1x10xf32> to vector<8x10xf32>
    %56 = arith.mulf %54, %55 : vector<8x10xf32>
    %57 = vector.extract_strided_slice %52 {offsets = [0, 1], sizes = [8, 1], strides = [1, 1]} : vector<8x2xf32> to vector<8x1xf32>
    %58 = vector.broadcast %57 : vector<8x1xf32> to vector<8x10xf32>
    %59 = vector.broadcast %6 : vector<1x10xf32> to vector<8x10xf32>
    %60 = arith.mulf %58, %59 : vector<8x10xf32>
    %61 = arith.addf %56, %60 : vector<8x10xf32>
    %62 = vector.broadcast %12 : vector<1x10xf32> to vector<8x10xf32>
    %63 = arith.addf %61, %62 : vector<8x10xf32>
    %cst_13 = arith.constant 0.000000e+00 : f32
    %64 = vector.broadcast %cst_13 : f32 to vector<8x10xf32>
    %65 = arith.maximumf %63, %64 : vector<8x10xf32>
    %cst_14 = arith.constant dense<0.000000e+00> : vector<10xf32>
    %66 = vector.multi_reduction <add>, %65, %cst_14 [0] : vector<8x10xf32> to vector<10xf32>
    %67 = vector.shape_cast %66 : vector<10xf32> to vector<1x10xf32>
    %cst_15 = arith.constant 8.000000e+00 : f32
    %68 = vector.broadcast %cst_15 : f32 to vector<1x10xf32>
    %69 = arith.divf %67, %68 : vector<1x10xf32>
    %70 = vector.broadcast %69 : vector<1x10xf32> to vector<8x10xf32>
    %71 = arith.subf %65, %70 : vector<8x10xf32>
    %72 = arith.mulf %71, %71 : vector<8x10xf32>
    %cst_16 = arith.constant dense<0.000000e+00> : vector<10xf32>
    %73 = vector.multi_reduction <add>, %72, %cst_16 [0] : vector<8x10xf32> to vector<10xf32>
    %74 = vector.shape_cast %73 : vector<10xf32> to vector<1x10xf32>
    %cst_17 = arith.constant 8.000000e+00 : f32
    %75 = vector.broadcast %cst_17 : f32 to vector<1x10xf32>
    %76 = arith.divf %74, %75 : vector<1x10xf32>
    %77 = vector.broadcast %69 : vector<1x10xf32> to vector<8x10xf32>
    %78 = arith.subf %65, %77 : vector<8x10xf32>
    %cst_18 = arith.constant 9.99999974E-6 : f32
    %79 = vector.broadcast %cst_18 : f32 to vector<1x10xf32>
    %80 = arith.addf %76, %79 : vector<1x10xf32>
    %81 = math.rsqrt %80 : vector<1x10xf32>
    %82 = vector.broadcast %81 : vector<1x10xf32> to vector<8x10xf32>
    %83 = arith.mulf %78, %82 : vector<8x10xf32>
    %84 = vector.broadcast %13 : vector<1x10xf32> to vector<8x10xf32>
    %85 = arith.mulf %83, %84 : vector<8x10xf32>
    %86 = vector.broadcast %14 : vector<1x10xf32> to vector<8x10xf32>
    %87 = arith.addf %85, %86 : vector<8x10xf32>
    %cst_19 = arith.constant dense<0.000000e+00> : vector<8x34xf32>
    %88 = tpu.matmul %87, %7, %cst_19 {dimension_numbers = #tpu.dot_dimension_numbers<[1], [0], [0], [1], [0, 0, 1, 1], [], []>} : vector<8x10xf32>, vector<10x34xf32>, vector<8x34xf32> -> vector<8x34xf32>
    %89 = vector.broadcast %15 : vector<1x34xf32> to vector<8x34xf32>
    %90 = arith.addf %88, %89 : vector<8x34xf32>
    %91 = arith.addf %90, %45 : vector<8x34xf32>
    %c0_20 = arith.constant 0 : index
    %c0_21 = arith.constant 0 : index
    %92 = vector.load %arg3[%c0_20, %c0_21] : memref<8x34xf32, #tpu.memory_space<vmem>>, vector<8x34xf32>
    tpu.vector_store %arg3[%c0_20, %c0_21], %91 {strides = array<i32>} : memref<8x34xf32, #tpu.memory_space<vmem>>, vector<8x34xf32>,
    return
  }
}

</mosaic_0001>

<bundles_post_ra>
// kernel: tpu_custom_call.1
= control target key start
LH: loop header
LB: loop body
LE: loop exit
PB: predicated region body
PF: predicated region fallthrough
CT: control target
= control target key end

     0   :  { %vm33_vm0 = vcmask 1045504   ;;  %v474_v1 = vmov 0.0   ;;  %vm475_vm1 = vmmov 0   ;;  %s590_s0 = inlined_call_operand.vmem [shape: f32[8,30], index: 0, kind: input, shape index: {}]   ;;  %s591_s1 = inlined_call_operand.vmem [shape: f32[8,2], index: 1, kind: input, shape index: {}]   ;;  %s592_s2 = inlined_call_operand.vmem [shape: f32[64,34], index: 2, kind: input, shape index: {}]   ;;  %s593_s3 = inlined_call_operand.hbm [shape: f32[8,34], index: 3, kind: output, shape index: {}]  }
   0x1   :  { %v20_v0 = vld [vmem:[%s592_s2 + $0x18] sm:$0xff]  ;;  %411 = vmatprep.subr.mxu0 %v474_v1  ;;  %v19_v2 = vld [vmem:[%s592_s2 + $0x10] sm:$0xff]  ;;  %419 = vmatprep.mubr.msk.f32.mxu0 %vm475_vm1, %v474_v1 }
   0x2   :  { %412 = vmatpush3.msk.msra.mxu0 %vm33_vm0, %v20_v0  ;;  %422 = vmatprep.subr.mxu1 %v474_v1 }
   0x3   :  { %8 = vsyncpa [#allocation3], 0  ;;  %413 = vmatprep.subr.mxu0 %v474_v1  ;;  %v18_v3 = vld [vmem:[%s592_s2 + $0x8] sm:$0xff]  ;;  %426 = vmatprep.mubr.msk.f32.mxu1 %vm475_vm1, %v474_v1  ;;  %v17_v4 = vld [vmem:[%s592_s2] sm:$0xff]  ;;  %vm29_vm2 = vcmask 244736   ;;  %vm148_vm3 = vcmask 1041408   ;;  %v25_v8 = vlaneseq }
   0x4   :  { %414 = vmatpush3.msra.mxu0 %v19_v2  ;;  %v15_v5 = vld [vmem:[%s590_s0] sm:$0xff]  ;;  %v528_v6 = vld [vmem:[%s592_s2 + $0x28] sm:$0xff]  ;;  %v543_v11 = vld [vmem:[%s592_s2 + $0x30] sm:$0xff]  ;;  %vm108_vm4 = vcmask 80896   ;;  %v477_v54 = vmov 30   ;;  %v478_v55 = vmov 31  }
   0x5   :  { %415 = vmatprep.subr.mxu0 %v474_v1  ;;  %v21_v7 = vld [vmem:[%s592_s2 + $0x20] sm:$0xff]  ;;  %423 = vmatpush3.msk.msra.mxu1 %vm148_vm3, %v528_v6  ;;  %v537_v9 = vshrl.u32 %v25_v8, 7  ;;  %v553_v38 = vld [vmem:[%s592_s2 + $0x38] sm:$0xff]  ;;  %v299_v44 = vrot.slane %v543_v11, 4  ;;  %s476_s2 = smov 96   ;;  %s479_s4 = smov 30  }
   0x6   :  { %416 = vmatpush3.msra.mxu0 %v18_v3  ;;  %424 = vmatprep.subr.mxu1 %v474_v1  ;;  %v16_v56 = vld [vmem:[%s591_s1] sm:$0xff]  ;;  %v298_v61 = vrot.slane %v528_v6, 4  ;;  %vm297_vm5 = vcmask 1043456   ;;  %s480_s1 = smov [#allocation2]   ;;  %vm378_vm6 = vcmask 277504  }
   0x7   :  { %417 = vmatprep.subr.mxu0 %v474_v1  ;;  %425 = vmatpush3.msra.mxu1 %v21_v7  ;;  %v27_v10 = vsub.s32 6, %v537_v9  ;;  %v133_v36 = vsub.s32 7, %v537_v9  ;;  %v138_v37 = vsub.s32 0, %v537_v9  ;;  %v143_v46 = vsub.s32 1, %v537_v9  ;;  %s386_s5 = sshll.u32 %s480_s1, 4  ;;  %s387_s5 = int_to_ptr.vmem [resolvable:$true] %s386_s5 }
   0x8   :  { %418 = vmatpush3.msra.mxu0 %v17_v4  ;;  %429 = vmatprep.subr.mxu1 %v474_v1  ;;  %v300_v62 = vsel %vm297_vm5, %v298_v61, %v299_v44  ;;  %v242_v63 = vsub.s32 2, %v537_v9  ;;  %v251_v0 = vsub.s32 3, %v537_v9  ;;  %s452_s6 = scalar_lea.vmem %s387_s5, 128  ;;  %p457_p1 = scmp.lt.s32.totalorder %s387_s5, %s387_s5 }
   0x9   :  { %420 = vmatmul.mubr.msk.f32.vlgmr.msra.gmra.mxu0 %vm29_vm2, %v15_v5  ;;  %v28_v12 = vrot.slane %v543_v11, %v27_v10  ;;  %v134_v39 = vrot.slane %v543_v11, %v133_v36  ;;  %v139_v42 = vrot.slane %v553_v38, %v138_v37  ;;  %v144_v47 = vrot.slane %v553_v38, %v143_v46  ;;  %p453_p0 = scmp.ne.s32.totalorder %s387_s5, %s452_s6  ;;  %p458_p2 = scmp.lt.s32.totalorder %s452_s6, %s452_s6 }
   0xa   :  { %443 = vset.pattern.permute.xlu1 %v477_v54  ;;  %445 = vset.pattern.permute.xlu0 %v478_v55  ;;  %v243_v2 = vrot.slane %v528_v6, %v242_v63  ;;  %v252_v3 = vrot.slane %v528_v6, %v251_v0  ;;  %v258_v7 = vrot.slane %v553_v38, %v242_v63 }
   0xb   :  { %p459_p3 = por %p458_p2, %p457_p1 }
   0xd   :  { %p460_p4 = pnand %p459_p3, %p453_p0 }
  0xc9   :  { %v103_v13 = vpop.f32.mrf.mxu0 }
  0xca   :  { %v104_v14 = vadd.f32 %v103_v13, %v28_v12 }
  0xcb   :  { %v421_v15 = vpop.f32.mrf.mxu0 }
  0xcc   :  { %v107_v16 = vmax.f32 %v104_v14, 0.0 }
  0xce   :  { %v109_v17 = vsel %vm108_vm4, %v107_v16, 0.0 }
  0xcf   :  { %v110_v18 = vrot.slane %v109_v17, 4 }
  0xd1   :  { %v111_v19 = vadd.f32 %v110_v18, %v109_v17 }
  0xd3   :  { %v112_v20 = vrot.slane %v111_v19, 2 }
  0xd5   :  { %v113_v21 = vadd.f32 %v112_v20, %v111_v19 }
  0xd7   :  { %v114_v22 = vrot.slane %v113_v21, 1 }
  0xd9   :  { %v115_v23 = vadd.f32 %v114_v22, %v113_v21 }
  0xdb   :  { %v117_v24 = vmul.f32 0.125, %v115_v23 }
  0xdd   :  { %v118_v25 = vsub.f32 %v107_v16, %v117_v24 }
  0xdf   :  { %v119_v26 = vmul.f32 %v118_v25, %v118_v25 }
  0xe1   :  { %v120_v27 = vsel %vm108_vm4, %v119_v26, 0.0 }
  0xe2   :  { %v121_v28 = vrot.slane %v120_v27, 4 }
  0xe4   :  { %v122_v29 = vadd.f32 %v121_v28, %v120_v27 }
  0xe6   :  { %v123_v30 = vrot.slane %v122_v29, 2 }
  0xe8   :  { %v124_v31 = vadd.f32 %v123_v30, %v122_v29 }
  0xea   :  { %v125_v32 = vrot.slane %v124_v31, 1 }
  0xec   :  { %v126_v33 = vadd.f32 %v125_v32, %v124_v31  ;;  %v289_v31 = vsub.s32 4, %v537_v9  ;;  %v285_v32 = vrot.slane %v553_v38, %v251_v0 }
  0xee   :  { %v127_v34 = vmul.f32 0.125, %v126_v33 }
  0xf0   :  { %v128_v35 = vadd.f32 1e-05, %v127_v34  ;;  %v290_v34 = vrot.slane %v553_v38, %v289_v31 }
  0xf2   :  { %446 = vrsqrt.f32 %v128_v35 }
  0xff   :  { %v447_v40 = vpop.eup %446 }
 0x100   :  { %v130_v41 = vmul.f32 %v447_v40, %v118_v25 }
 0x102   :  { %v135_v43 = vmul.f32 %v134_v39, %v130_v41  ;;  %v294_v39 = vsub.s32 5, %v537_v9 }
 0x104   :  { %v140_v45 = vadd.f32 %v139_v42, %v135_v43  ;;  %v295_v40 = vrot.slane %v553_v38, %v294_v39 }
 0x106   :  { %427 = vmatmul.mubr.msk.f32.vlgmr.msra.gmra.mxu1 %vm108_vm4, %v140_v45 }
 0x107   :  { %430 = vmatpush3.msk.msra.mxu1 %vm148_vm3, %v299_v44  ;;  %433 = vmatprep.mubr.msk.f32.mxu1 %vm475_vm1, %v474_v1 }
 0x108   :  { %431 = vmatprep.subr.mxu1 %v474_v1 }
 0x109   :  { %432 = vmatpush3.msra.mxu1 %v300_v62 }
 0x1c6   :  { %v218_v48 = vpop.f32.mrf.mxu1 }
 0x1c7   :  { %v565_v49 = vadd.f32 %v218_v48, %v144_v47 }
 0x1c8   :  { %v428_v50 = vpop.f32.mrf.mxu1 }
 0x1c9   :  { %v222_v51 = vmul.f32 0.5, %v565_v49 }
 0x1cb   :  { %v223_v52 = vmul.f32 1.442695, %v222_v51 }
 0x1cd   :  { %448 = vpow2.f32 %v223_v52 }
 0x1da   :  { %v449_v53 = vpop.eup %448 }
 0x1db   :  { %226 = vrot.lane.b32.xlu0 %v449_v53, %s476_s2 }
 0x24d   :  { %v227_v57 = vpop.permute.xlu0 %226 }
 0x24e   :  { %v229_v58 = vmul.f32 %v227_v57, %v16_v56 }
 0x250   :  { %231 = vrot.lane.b32.xlu0 %v229_v58, %s479_s4 }
 0x2c2   :  { %v232_v59 = vpop.permute.xlu0 %231 }
 0x2c3   :  { %v234_v60 = vadd.f32 %v232_v59, %v565_v49 }
 0x2c5   :  { %237 = vperm.xlu1 %443, %v234_v60  }
 0x2c9   :  { %444 = vset.pattern.permute.xlu1 %v478_v55 }
 0x2ca   :  { %246 = vperm.xlu1 %444, %v234_v60  }
 0x340   :  { %v238_v1 = vpop.permute.xlu1 %237 }
 0x341   :  { %v244_v5 = vmul.f32 %v243_v2, %v238_v1 }
 0x345   :  { %v247_v4 = vpop.permute.xlu1 %246 }
 0x346   :  { %v253_v8 = vmul.f32 %v252_v3, %v247_v4 }
 0x348   :  { %v254_v10 = vadd.f32 %v253_v8, %v244_v5 }
 0x34a   :  { %v259_v11 = vadd.f32 %v258_v7, %v254_v10 }
 0x34c   :  { %v260_v12 = vmax.f32 %v259_v11, 0.0 }
 0x34e   :  { %v261_v13 = vsel %vm108_vm4, %v260_v12, 0.0 }
 0x34f   :  { %v262_v14 = vrot.slane %v261_v13, 4 }
 0x351   :  { %v263_v15 = vadd.f32 %v262_v14, %v261_v13 }
 0x353   :  { %v264_v16 = vrot.slane %v263_v15, 2 }
 0x355   :  { %v265_v17 = vadd.f32 %v264_v16, %v263_v15 }
 0x357   :  { %v266_v18 = vrot.slane %v265_v17, 1 }
 0x359   :  { %v267_v19 = vadd.f32 %v266_v18, %v265_v17 }
 0x35b   :  { %v268_v20 = vmul.f32 0.125, %v267_v19 }
 0x35d   :  { %v269_v21 = vsub.f32 %v260_v12, %v268_v20 }
 0x35f   :  { %v270_v22 = vmul.f32 %v269_v21, %v269_v21 }
 0x361   :  { %v271_v6 = vsel %vm108_vm4, %v270_v22, 0.0 }
 0x362   :  { %v272_v23 = vrot.slane %v271_v6, 4 }
 0x364   :  { %v273_v24 = vadd.f32 %v272_v23, %v271_v6 }
 0x366   :  { %v274_v25 = vrot.slane %v273_v24, 2 }
 0x368   :  { %v275_v26 = vadd.f32 %v274_v25, %v273_v24 }
 0x36a   :  { %v276_v27 = vrot.slane %v275_v26, 1 }
 0x36c   :  { %v277_v28 = vadd.f32 %v276_v27, %v275_v26 }
 0x36e   :  { %v278_v29 = vmul.f32 0.125, %v277_v28 }
 0x370   :  { %v279_v30 = vadd.f32 1e-05, %v278_v29 }
 0x372   :  { %450 = vrsqrt.f32 %v279_v30 }
 0x37f   :  { %v451_v33 = vpop.eup %450 }
 0x380   :  { %v281_v35 = vmul.f32 %v451_v33, %v269_v21 }
 0x382   :  { %v286_v36 = vmul.f32 %v285_v32, %v281_v35 }
 0x384   :  { %v291_v37 = vadd.f32 %v290_v34, %v286_v36 }
 0x386   :  { %434 = vmatmul.mubr.msk.f32.vlgmr.msra.gmra.mxu1 %vm108_vm4, %v291_v37 }
 0x446   :  { %v373_v41 = vpop.f32.mrf.mxu1 }
 0x447   :  { %v374_v42 = vadd.f32 %v373_v41, %v295_v40 }
 0x448   :  { %v435_v43 = vpop.f32.mrf.mxu1 }
 0x449   :  { %v377_v44 = vadd.f32 %v374_v42, %v565_v49 }
 0x44b   :  { %379 = vst.msk [vmem:[#allocation2] sm:$0xff] %vm378_vm6, %v377_v44 }
 0x44c   :  { %463 = shalt.err (!%p460_p4)
}
 0x44d   :  { %389 = dma.vmem_to_hbm [thread:$0]  %s387_s5, 128, %s593_s3, [#allocation3]  }
 0x44e   :  { %472 = dma.done.wait [#allocation3], 128  }
 0x44f   :  { %473 = vsyncadd [#allocation3], 4294967168 }
 0x450   :  { %393 = vsyncpa [#allocation3], 1 }

</bundles_post_ra>
